<compile_context>
chip_gen: v7x
topology: tpu7x:2x2x1
jax: 0.10.0
libtpu: 0.0.40
codegen_flags: <defaults>
</compile_context>

<pallas_src>
import numpy as np
import jax
import jax.numpy as jnp
from jax.experimental import pallas as pl
from jax.experimental.pallas import tpu as pltpu

# ---- small shapes consistent with the module's forward ----
B = 2              # batch
C_IN = 4           # input channels
IN = 16            # input_size (spatial)
PS = 8             # patch_size
OVL = 4            # overlap
STRIDE = PS - OVL  # 4
LATENT = 32        # latent_size
HIDDEN = 64        # decoder hidden width
CONV_K = 4         # conv_model kernel == stride
NP = IN // CONV_K  # 4 patches per spatial dim (== fold blocks per dim)
N = NP * NP        # 16 patches total
P2 = PS * PS       # 64 pixels per decoded patch
FOLD = IN + STRIDE # 20 = uncropped fold output size
CROP = STRIDE // 2 # 2
CKK = C_IN * CONV_K * CONV_K  # 64
assert (FOLD - PS) // STRIDE + 1 == NP  # fold block count matches conv output


# --------------------------- fused Pallas kernel -----------------------------

def _convae_fused_kernel(xp_ref, wf_ref, bf_ref, w2_ref, b2_ref, s_ref,
                         out_ref):
    """Fused conv-encode + decoder MLP + fold/normalize/crop.

    xp_ref   : (N*B, CKK)    conv receptive fields, PATCH-major rows (n*B + b)
    wf_ref   : (CKK, HIDDEN) conv weights pre-fused into decoder layer 1
    bf_ref   : (1, HIDDEN)   fused bias
    w2_ref   : (HIDDEN, P2)  b2_ref: (1, P2)
    s_ref    : (N*P2, IN*IN) bf16, fold scatter matrix pre-scaled by 1/norm
    out_ref  : (B, IN*IN)    lane-dense final output
    """
    bn = out_ref.shape[0]

    # decoder layer 1 (conv already folded in) + ReLU  (f32 MXU, f32 acc)
    h = jnp.maximum(
        jnp.dot(xp_ref[...], wf_ref[...], preferred_element_type=jnp.float32)
        + bf_ref[...], 0.0)
    # decoder layer 2 + Sigmoid  -> decoded patches, rows = (patch n, batch b)
    dec = jax.nn.sigmoid(
        jnp.dot(h, w2_ref[...], preferred_element_type=jnp.float32)
        + b2_ref[...])

    # fold + normalization + crop as an unrolled per-patch MXU accumulation.
    # S is bf16 (entries {0,.25,.5,1} are exact); dec is cast to bf16 so the
    # MXU gets its native bf16 inputs with f32 accumulation (<=2^-9 relative
    # rounding on the [0,1] sigmoid outputs).  No staging scratch, no S upcast.
    dec16 = dec.astype(jnp.bfloat16)
    acc = jnp.zeros((bn, out_ref.shape[1]), jnp.float32)
    for n in range(N):
        acc = acc + jnp.dot(dec16[n * bn:(n + 1) * bn, :],
                            s_ref[n * P2:(n + 1) * P2, :],
                            preferred_element_type=jnp.float32)
    out_ref[...] = acc


# --------------------------- pallas_call glue --------------------------------

def _full_spec(shape):
    nd = len(shape)
    # grid=(1,): the default double-buffer on S is ~512 KB of dead VMEM, which
    # is negligible even on v7x's 64 MiB, so we keep default pipeline_mode.
    return pl.BlockSpec(shape, lambda i, _nd=nd: (0,) * _nd)


def build_fold_matrix():
    """Scatter matrix mapping (patch n, patch-pixel p) -> cropped output pixel,
    pre-scaled by 1/normalization_map (values {1,2,4} -> exact in bf16)."""
    S = np.zeros((N * P2, IN * IN), dtype=np.float32)
    for ph in range(NP):
        for pw in range(NP):
            n = ph * NP + pw
            for kh in range(PS):
                for kw in range(PS):
                    r = ph * STRIDE + kh - CROP
                    c = pw * STRIDE + kw - CROP
                    if 0 <= r < IN and 0 <= c < IN:
                        S[n * P2 + kh * PS + kw, r * IN + c] = 1.0
    norm = S.sum(axis=0)                       # every output pixel covered >= 1
    assert np.all(norm >= 1.0)
    # bf16 exactness of the pre-scaled matrix relies on the coverage counts
    # being exactly {1, 2, 4} (powers of two) for this PS/STRIDE/CROP config.
    assert np.all(np.isin(norm, (1.0, 2.0, 4.0))), np.unique(norm)
    S_scaled = S / norm[None, :]               # entries in {0, 0.25, 0.5, 1.0}
    S_bf16 = jnp.asarray(S_scaled, dtype=jnp.bfloat16)
    assert np.array_equal(np.asarray(S_bf16, dtype=np.float32), S_scaled), \
        "fold matrix is not exactly representable in bf16"
    # TODO(synk): on v7x the values are also exact in fp8 (e4m3); storing S in
    #             fp8 would halve the (dominant, fully exposed) S DMA there.
    return S_bf16


def prepare_params(Wc, bc, W1, b1, W2, b2):
    """Host-side one-time prep: fuse the activation-free conv into decoder L1."""
    wc2 = Wc.reshape(LATENT, CKK).T                 # (CKK, LATENT), (c,kh,kw) order
    Wf = (wc2 @ W1).astype(jnp.float32)             # (CKK, HIDDEN)
    bf = (bc @ W1 + b1).astype(jnp.float32)         # (HIDDEN,)
    S_scaled = build_fold_matrix()
    return (Wf, bf, W2.astype(jnp.float32), b2.astype(jnp.float32), S_scaled)


def convae_forward(x, fused_params):
    """x: (B, C_IN, IN, IN) NCHW  ->  (B, 1, IN, IN)."""
    Wf, bf, W2, b2, S_scaled = fused_params
    Bn = x.shape[0]

    # glue: extract non-overlapping KxK conv receptive fields, patch-major rows
    # (row = n*Bn + b), columns in (c, kh, kw) order to match Wc flattening.
    # TODO(synk): at real sizes this extraction should move into the kernel via
    #             an index_map over (ph, pw) instead of materializing xp in HBM;
    #             at B*N=32 it stays a single tiny XLA fusion inside this jit.
    xp = x.reshape(Bn, C_IN, NP, CONV_K, NP, CONV_K)
    xp = xp.transpose(2, 4, 0, 1, 3, 5).reshape(N * Bn, CKK)

    args = (xp, Wf, bf.reshape(1, HIDDEN), W2, b2.reshape(1, P2), S_scaled)

    flops = (2 * N * Bn * CKK * HIDDEN          # fused conv+decoder layer 1
             + 2 * N * Bn * HIDDEN * P2         # decoder layer 2
             + 2 * Bn * (N * P2) * (IN * IN))   # fold accumulation matmuls
    bytes_accessed = (sum(int(np.prod(a.shape)) * a.dtype.itemsize for a in args)
                      + Bn * IN * IN * 4)

    # TODO(synk): once the batch grows (>=128 rows on v5e, >=256 on v6e/v7x),
    #             add a leading row-block grid axis marked "parallel" so v7x's
    #             two TensorCores split the batch; at B=2 it would only add
    #             per-step overhead, so keep grid=(1,).
    out = pl.pallas_call(
        _convae_fused_kernel,
        out_shape=jax.ShapeDtypeStruct((Bn, IN * IN), jnp.float32),
        grid=(1,),
        in_specs=[_full_spec(a.shape) for a in args],
        out_specs=_full_spec((Bn, IN * IN)),
        compiler_params=pltpu.CompilerParams(
            dimension_semantics=("arbitrary",)),
        cost_estimate=pl.CostEstimate(
            flops=flops, transcendentals=N * Bn * P2,
            bytes_accessed=bytes_accessed),
    )(*args)
    return out.reshape(Bn, 1, IN, IN)


# --------------------------- pure-JAX reference -------------------------------

def reference_forward(x, Wc, bc, W1, b1, W2, b2):
    Bn = x.shape[0]
    lat_map = jax.lax.conv_general_dilated(
        x, Wc, window_strides=(CONV_K, CONV_K), padding="VALID",
        dimension_numbers=("NCHW", "OIHW", "NCHW"))
    lat_map = lat_map + bc.reshape(1, -1, 1, 1)             # (B, LATENT, NP, NP)
    z = lat_map.reshape(Bn, LATENT, -1).transpose(0, 2, 1)  # (B, N, LATENT)
    h = jnp.maximum(z @ W1 + b1, 0.0)
    dec = jax.nn.sigmoid(h @ W2 + b2)                        # (B, N, P2)

    out_full = jnp.zeros((Bn, 1, FOLD, FOLD), jnp.float32)
    cnt = jnp.zeros_like(out_full)
    for ph in range(NP):
        for pw in range(NP):
            n = ph * NP + pw
            patch = dec[:, n, :].reshape(Bn, 1, PS, PS)
            out_full = out_full.at[:, :, ph * STRIDE:ph * STRIDE + PS,
                                   pw * STRIDE:pw * STRIDE + PS].add(patch)
            cnt = cnt.at[:, :, ph * STRIDE:ph * STRIDE + PS,
                         pw * STRIDE:pw * STRIDE + PS].add(1.0)
    out = out_full / cnt
    return out[:, :, CROP:CROP + IN, CROP:CROP + IN]


# --------------------------------- main ---------------------------------------

if __name__ == "__main__":
    key = jax.random.PRNGKey(0)
    ks = jax.random.split(key, 7)
    Wc = jax.random.normal(ks[0], (LATENT, C_IN, CONV_K, CONV_K), jnp.float32) * 0.1
    bc = jax.random.normal(ks[1], (LATENT,), jnp.float32) * 0.01
    W1 = jax.random.normal(ks[2], (LATENT, HIDDEN), jnp.float32) * 0.1
    b1 = jax.random.normal(ks[3], (HIDDEN,), jnp.float32) * 0.01
    W2 = jax.random.normal(ks[4], (HIDDEN, P2), jnp.float32) * 0.1
    b2 = jax.random.normal(ks[5], (P2,), jnp.float32) * 0.01
    x = jax.random.normal(ks[6], (B, C_IN, IN, IN), jnp.float32)

    fused_params = prepare_params(Wc, bc, W1, b1, W2, b2)
    fwd = jax.jit(convae_forward)

    out = jax.block_until_ready(fwd(x, fused_params))
    ref = jax.block_until_ready(reference_forward(x, Wc, bc, W1, b1, W2, b2))

    assert out.shape == (B, 1, IN, IN), out.shape
    # Tolerance re-validated for the bf16 fold-matmul LHS: sigmoid outputs in
    # [0,1] pick up <= 2^-9 (~0.2%) relative rounding; weights sum to 1, so the
    # output error stays <= ~2e-3 relative on top of the f32 baseline.
    np.testing.assert_allclose(np.asarray(out), np.asarray(ref),
                               rtol=3e-3, atol=3e-3)
    print("KERNEL_OK")
</pallas_src>

<mosaic_0001>
module attributes {stable_mosaic.version = 11 : i64} {
  func.func @_convae_fused_kernel(%arg0: i32, %arg1: memref<32x64xf32, #tpu.memory_space<vmem>>, %arg2: memref<64x64xf32, #tpu.memory_space<vmem>>, %arg3: memref<1x64xf32, #tpu.memory_space<vmem>>, %arg4: memref<64x64xf32, #tpu.memory_space<vmem>>, %arg5: memref<1x64xf32, #tpu.memory_space<vmem>>, %arg6: memref<1024x256xbf16, #tpu.memory_space<vmem>>, %arg7: memref<2x256xf32, #tpu.memory_space<vmem>>) attributes {dimension_semantics = [#tpu.dimension_semantics<arbitrary>], iteration_bounds = array<i64: 1>, scalar_prefetch = 0 : i64, scratch_operands = 0 : i64, tpu.core_type = #tpu.core_type<tc>, window_params = [{pipeline_mode = #tpu.pipeline_mode<synchronous>, transform_indices = @transform_0, window_bounds = array<i64: 32, 64>}, {pipeline_mode = #tpu.pipeline_mode<synchronous>, transform_indices = @transform_1, window_bounds = array<i64: 64, 64>}, {pipeline_mode = #tpu.pipeline_mode<synchronous>, transform_indices = @transform_2, window_bounds = array<i64: 1, 64>}, {pipeline_mode = #tpu.pipeline_mode<synchronous>, transform_indices = @transform_3, window_bounds = array<i64: 64, 64>}, {pipeline_mode = #tpu.pipeline_mode<synchronous>, transform_indices = @transform_4, window_bounds = array<i64: 1, 64>}, {pipeline_mode = #tpu.pipeline_mode<synchronous>, transform_indices = @transform_5, window_bounds = array<i64: 1024, 256>}, {pipeline_mode = #tpu.pipeline_mode<synchronous>, transform_indices = @transform_6, window_bounds = array<i64: 2, 256>}]} {
    %c0 = arith.constant 0 : index
    %c0_0 = arith.constant 0 : index
    %0 = vector.load %arg1[%c0, %c0_0] : memref<32x64xf32, #tpu.memory_space<vmem>>, vector<32x64xf32>
    %c0_1 = arith.constant 0 : index
    %c0_2 = arith.constant 0 : index
    %1 = vector.load %arg2[%c0_1, %c0_2] : memref<64x64xf32, #tpu.memory_space<vmem>>, vector<64x64xf32>
    %cst = arith.constant dense<0.000000e+00> : vector<32x64xf32>
    %2 = tpu.matmul %0, %1, %cst {dimension_numbers = #tpu.dot_dimension_numbers<[1], [0], [0], [1], [0, 0, 1, 1], [], []>} : vector<32x64xf32>, vector<64x64xf32>, vector<32x64xf32> -> vector<32x64xf32>
    %c0_3 = arith.constant 0 : index
    %c0_4 = arith.constant 0 : index
    %3 = vector.load %arg3[%c0_3, %c0_4] : memref<1x64xf32, #tpu.memory_space<vmem>>, vector<1x64xf32>
    %4 = vector.broadcast %3 : vector<1x64xf32> to vector<32x64xf32>
    %5 = arith.addf %2, %4 : vector<32x64xf32>
    %cst_5 = arith.constant 0.000000e+00 : f32
    %6 = vector.broadcast %cst_5 : f32 to vector<32x64xf32>
    %7 = arith.maximumf %5, %6 : vector<32x64xf32>
    %c0_6 = arith.constant 0 : index
    %c0_7 = arith.constant 0 : index
    %8 = vector.load %arg4[%c0_6, %c0_7] : memref<64x64xf32, #tpu.memory_space<vmem>>, vector<64x64xf32>
    %cst_8 = arith.constant dense<0.000000e+00> : vector<32x64xf32>
    %9 = tpu.matmul %7, %8, %cst_8 {dimension_numbers = #tpu.dot_dimension_numbers<[1], [0], [0], [1], [0, 0, 1, 1], [], []>} : vector<32x64xf32>, vector<64x64xf32>, vector<32x64xf32> -> vector<32x64xf32>
    %c0_9 = arith.constant 0 : index
    %c0_10 = arith.constant 0 : index
    %10 = vector.load %arg5[%c0_9, %c0_10] : memref<1x64xf32, #tpu.memory_space<vmem>>, vector<1x64xf32>
    %11 = vector.broadcast %10 : vector<1x64xf32> to vector<32x64xf32>
    %12 = arith.addf %9, %11 : vector<32x64xf32>
    %13 = arith.negf %12 : vector<32x64xf32>
    %14 = math.exp %13 : vector<32x64xf32>
    %cst_11 = arith.constant 1.000000e+00 : f32
    %15 = vector.broadcast %cst_11 : f32 to vector<32x64xf32>
    %16 = arith.addf %15, %14 : vector<32x64xf32>
    %17 = arith.divf %15, %16 : vector<32x64xf32>
    %18 = arith.truncf %17 : vector<32x64xf32> to vector<32x64xbf16>
    %cst_12 = arith.constant 0.000000e+00 : f32
    %19 = vector.broadcast %cst_12 : f32 to vector<2x256xf32>
    %20 = vector.extract_strided_slice %18 {offsets = [0, 0], sizes = [2, 64], strides = [1, 1]} : vector<32x64xbf16> to vector<2x64xbf16>
    %c0_13 = arith.constant 0 : index
    %c0_14 = arith.constant 0 : index
    %21 = vector.load %arg6[%c0_13, %c0_14] : memref<1024x256xbf16, #tpu.memory_space<vmem>>, vector<64x256xbf16>
    %cst_15 = arith.constant dense<0.000000e+00> : vector<2x256xf32>
    %22 = tpu.matmul %20, %21, %cst_15 {dimension_numbers = #tpu.dot_dimension_numbers<[1], [0], [0], [1], [0, 0, 1, 1], [], []>} : vector<2x64xbf16>, vector<64x256xbf16>, vector<2x256xf32> -> vector<2x256xf32>
    %23 = arith.addf %19, %22 : vector<2x256xf32>
    %24 = vector.extract_strided_slice %18 {offsets = [2, 0], sizes = [2, 64], strides = [1, 1]} : vector<32x64xbf16> to vector<2x64xbf16>
    %c64 = arith.constant 64 : index
    %c0_16 = arith.constant 0 : index
    %25 = vector.load %arg6[%c64, %c0_16] : memref<1024x256xbf16, #tpu.memory_space<vmem>>, vector<64x256xbf16>
    %cst_17 = arith.constant dense<0.000000e+00> : vector<2x256xf32>
    %26 = tpu.matmul %24, %25, %cst_17 {dimension_numbers = #tpu.dot_dimension_numbers<[1], [0], [0], [1], [0, 0, 1, 1], [], []>} : vector<2x64xbf16>, vector<64x256xbf16>, vector<2x256xf32> -> vector<2x256xf32>
    %27 = arith.addf %23, %26 : vector<2x256xf32>
    %28 = vector.extract_strided_slice %18 {offsets = [4, 0], sizes = [2, 64], strides = [1, 1]} : vector<32x64xbf16> to vector<2x64xbf16>
    %c128 = arith.constant 128 : index
    %c0_18 = arith.constant 0 : index
    %29 = vector.load %arg6[%c128, %c0_18] : memref<1024x256xbf16, #tpu.memory_space<vmem>>, vector<64x256xbf16>
    %cst_19 = arith.constant dense<0.000000e+00> : vector<2x256xf32>
    %30 = tpu.matmul %28, %29, %cst_19 {dimension_numbers = #tpu.dot_dimension_numbers<[1], [0], [0], [1], [0, 0, 1, 1], [], []>} : vector<2x64xbf16>, vector<64x256xbf16>, vector<2x256xf32> -> vector<2x256xf32>
    %31 = arith.addf %27, %30 : vector<2x256xf32>
    %32 = vector.extract_strided_slice %18 {offsets = [6, 0], sizes = [2, 64], strides = [1, 1]} : vector<32x64xbf16> to vector<2x64xbf16>
    %c192 = arith.constant 192 : index
    %c0_20 = arith.constant 0 : index
    %33 = vector.load %arg6[%c192, %c0_20] : memref<1024x256xbf16, #tpu.memory_space<vmem>>, vector<64x256xbf16>
    %cst_21 = arith.constant dense<0.000000e+00> : vector<2x256xf32>
    %34 = tpu.matmul %32, %33, %cst_21 {dimension_numbers = #tpu.dot_dimension_numbers<[1], [0], [0], [1], [0, 0, 1, 1], [], []>} : vector<2x64xbf16>, vector<64x256xbf16>, vector<2x256xf32> -> vector<2x256xf32>
    %35 = arith.addf %31, %34 : vector<2x256xf32>
    %36 = vector.extract_strided_slice %18 {offsets = [8, 0], sizes = [2, 64], strides = [1, 1]} : vector<32x64xbf16> to vector<2x64xbf16>
    %c256 = arith.constant 256 : index
    %c0_22 = arith.constant 0 : index
    %37 = vector.load %arg6[%c256, %c0_22] : memref<1024x256xbf16, #tpu.memory_space<vmem>>, vector<64x256xbf16>
    %cst_23 = arith.constant dense<0.000000e+00> : vector<2x256xf32>
    %38 = tpu.matmul %36, %37, %cst_23 {dimension_numbers = #tpu.dot_dimension_numbers<[1], [0], [0], [1], [0, 0, 1, 1], [], []>} : vector<2x64xbf16>, vector<64x256xbf16>, vector<2x256xf32> -> vector<2x256xf32>
    %39 = arith.addf %35, %38 : vector<2x256xf32>
    %40 = vector.extract_strided_slice %18 {offsets = [10, 0], sizes = [2, 64], strides = [1, 1]} : vector<32x64xbf16> to vector<2x64xbf16>
    %c320 = arith.constant 320 : index
    %c0_24 = arith.constant 0 : index
    %41 = vector.load %arg6[%c320, %c0_24] : memref<1024x256xbf16, #tpu.memory_space<vmem>>, vector<64x256xbf16>
    %cst_25 = arith.constant dense<0.000000e+00> : vector<2x256xf32>
    %42 = tpu.matmul %40, %41, %cst_25 {dimension_numbers = #tpu.dot_dimension_numbers<[1], [0], [0], [1], [0, 0, 1, 1], [], []>} : vector<2x64xbf16>, vector<64x256xbf16>, vector<2x256xf32> -> vector<2x256xf32>
    %43 = arith.addf %39, %42 : vector<2x256xf32>
    %44 = vector.extract_strided_slice %18 {offsets = [12, 0], sizes = [2, 64], strides = [1, 1]} : vector<32x64xbf16> to vector<2x64xbf16>
    %c384 = arith.constant 384 : index
    %c0_26 = arith.constant 0 : index
    %45 = vector.load %arg6[%c384, %c0_26] : memref<1024x256xbf16, #tpu.memory_space<vmem>>, vector<64x256xbf16>
    %cst_27 = arith.constant dense<0.000000e+00> : vector<2x256xf32>
    %46 = tpu.matmul %44, %45, %cst_27 {dimension_numbers = #tpu.dot_dimension_numbers<[1], [0], [0], [1], [0, 0, 1, 1], [], []>} : vector<2x64xbf16>, vector<64x256xbf16>, vector<2x256xf32> -> vector<2x256xf32>
    %47 = arith.addf %43, %46 : vector<2x256xf32>
    %48 = vector.extract_strided_slice %18 {offsets = [14, 0], sizes = [2, 64], strides = [1, 1]} : vector<32x64xbf16> to vector<2x64xbf16>
    %c448 = arith.constant 448 : index
    %c0_28 = arith.constant 0 : index
    %49 = vector.load %arg6[%c448, %c0_28] : memref<1024x256xbf16, #tpu.memory_space<vmem>>, vector<64x256xbf16>
    %cst_29 = arith.constant dense<0.000000e+00> : vector<2x256xf32>
    %50 = tpu.matmul %48, %49, %cst_29 {dimension_numbers = #tpu.dot_dimension_numbers<[1], [0], [0], [1], [0, 0, 1, 1], [], []>} : vector<2x64xbf16>, vector<64x256xbf16>, vector<2x256xf32> -> vector<2x256xf32>
    %51 = arith.addf %47, %50 : vector<2x256xf32>
    %52 = vector.extract_strided_slice %18 {offsets = [16, 0], sizes = [2, 64], strides = [1, 1]} : vector<32x64xbf16> to vector<2x64xbf16>
    %c512 = arith.constant 512 : index
    %c0_30 = arith.constant 0 : index
    %53 = vector.load %arg6[%c512, %c0_30] : memref<1024x256xbf16, #tpu.memory_space<vmem>>, vector<64x256xbf16>
    %cst_31 = arith.constant dense<0.000000e+00> : vector<2x256xf32>
    %54 = tpu.matmul %52, %53, %cst_31 {dimension_numbers = #tpu.dot_dimension_numbers<[1], [0], [0], [1], [0, 0, 1, 1], [], []>} : vector<2x64xbf16>, vector<64x256xbf16>, vector<2x256xf32> -> vector<2x256xf32>
    %55 = arith.addf %51, %54 : vector<2x256xf32>
    %56 = vector.extract_strided_slice %18 {offsets = [18, 0], sizes = [2, 64], strides = [1, 1]} : vector<32x64xbf16> to vector<2x64xbf16>
    %c576 = arith.constant 576 : index
    %c0_32 = arith.constant 0 : index
    %57 = vector.load %arg6[%c576, %c0_32] : memref<1024x256xbf16, #tpu.memory_space<vmem>>, vector<64x256xbf16>
    %cst_33 = arith.constant dense<0.000000e+00> : vector<2x256xf32>
    %58 = tpu.matmul %56, %57, %cst_33 {dimension_numbers = #tpu.dot_dimension_numbers<[1], [0], [0], [1], [0, 0, 1, 1], [], []>} : vector<2x64xbf16>, vector<64x256xbf16>, vector<2x256xf32> -> vector<2x256xf32>
    %59 = arith.addf %55, %58 : vector<2x256xf32>
    %60 = vector.extract_strided_slice %18 {offsets = [20, 0], sizes = [2, 64], strides = [1, 1]} : vector<32x64xbf16> to vector<2x64xbf16>
    %c640 = arith.constant 640 : index
    %c0_34 = arith.constant 0 : index
    %61 = vector.load %arg6[%c640, %c0_34] : memref<1024x256xbf16, #tpu.memory_space<vmem>>, vector<64x256xbf16>
    %cst_35 = arith.constant dense<0.000000e+00> : vector<2x256xf32>
    %62 = tpu.matmul %60, %61, %cst_35 {dimension_numbers = #tpu.dot_dimension_numbers<[1], [0], [0], [1], [0, 0, 1, 1], [], []>} : vector<2x64xbf16>, vector<64x256xbf16>, vector<2x256xf32> -> vector<2x256xf32>
    %63 = arith.addf %59, %62 : vector<2x256xf32>
    %64 = vector.extract_strided_slice %18 {offsets = [22, 0], sizes = [2, 64], strides = [1, 1]} : vector<32x64xbf16> to vector<2x64xbf16>
    %c704 = arith.constant 704 : index
    %c0_36 = arith.constant 0 : index
    %65 = vector.load %arg6[%c704, %c0_36] : memref<1024x256xbf16, #tpu.memory_space<vmem>>, vector<64x256xbf16>
    %cst_37 = arith.constant dense<0.000000e+00> : vector<2x256xf32>
    %66 = tpu.matmul %64, %65, %cst_37 {dimension_numbers = #tpu.dot_dimension_numbers<[1], [0], [0], [1], [0, 0, 1, 1], [], []>} : vector<2x64xbf16>, vector<64x256xbf16>, vector<2x256xf32> -> vector<2x256xf32>
    %67 = arith.addf %63, %66 : vector<2x256xf32>
    %68 = vector.extract_strided_slice %18 {offsets = [24, 0], sizes = [2, 64], strides = [1, 1]} : vector<32x64xbf16> to vector<2x64xbf16>
    %c768 = arith.constant 768 : index
    %c0_38 = arith.constant 0 : index
    %69 = vector.load %arg6[%c768, %c0_38] : memref<1024x256xbf16, #tpu.memory_space<vmem>>, vector<64x256xbf16>
    %cst_39 = arith.constant dense<0.000000e+00> : vector<2x256xf32>
    %70 = tpu.matmul %68, %69, %cst_39 {dimension_numbers = #tpu.dot_dimension_numbers<[1], [0], [0], [1], [0, 0, 1, 1], [], []>} : vector<2x64xbf16>, vector<64x256xbf16>, vector<2x256xf32> -> vector<2x256xf32>
    %71 = arith.addf %67, %70 : vector<2x256xf32>
    %72 = vector.extract_strided_slice %18 {offsets = [26, 0], sizes = [2, 64], strides = [1, 1]} : vector<32x64xbf16> to vector<2x64xbf16>
    %c832 = arith.constant 832 : index
    %c0_40 = arith.constant 0 : index
    %73 = vector.load %arg6[%c832, %c0_40] : memref<1024x256xbf16, #tpu.memory_space<vmem>>, vector<64x256xbf16>
    %cst_41 = arith.constant dense<0.000000e+00> : vector<2x256xf32>
    %74 = tpu.matmul %72, %73, %cst_41 {dimension_numbers = #tpu.dot_dimension_numbers<[1], [0], [0], [1], [0, 0, 1, 1], [], []>} : vector<2x64xbf16>, vector<64x256xbf16>, vector<2x256xf32> -> vector<2x256xf32>
    %75 = arith.addf %71, %74 : vector<2x256xf32>
    %76 = vector.extract_strided_slice %18 {offsets = [28, 0], sizes = [2, 64], strides = [1, 1]} : vector<32x64xbf16> to vector<2x64xbf16>
    %c896 = arith.constant 896 : index
    %c0_42 = arith.constant 0 : index
    %77 = vector.load %arg6[%c896, %c0_42] : memref<1024x256xbf16, #tpu.memory_space<vmem>>, vector<64x256xbf16>
    %cst_43 = arith.constant dense<0.000000e+00> : vector<2x256xf32>
    %78 = tpu.matmul %76, %77, %cst_43 {dimension_numbers = #tpu.dot_dimension_numbers<[1], [0], [0], [1], [0, 0, 1, 1], [], []>} : vector<2x64xbf16>, vector<64x256xbf16>, vector<2x256xf32> -> vector<2x256xf32>
    %79 = arith.addf %75, %78 : vector<2x256xf32>
    %80 = vector.extract_strided_slice %18 {offsets = [30, 0], sizes = [2, 64], strides = [1, 1]} : vector<32x64xbf16> to vector<2x64xbf16>
    %c960 = arith.constant 960 : index
    %c0_44 = arith.constant 0 : index
    %81 = vector.load %arg6[%c960, %c0_44] : memref<1024x256xbf16, #tpu.memory_space<vmem>>, vector<64x256xbf16>
    %cst_45 = arith.constant dense<0.000000e+00> : vector<2x256xf32>
    %82 = tpu.matmul %80, %81, %cst_45 {dimension_numbers = #tpu.dot_dimension_numbers<[1], [0], [0], [1], [0, 0, 1, 1], [], []>} : vector<2x64xbf16>, vector<64x256xbf16>, vector<2x256xf32> -> vector<2x256xf32>
    %83 = arith.addf %79, %82 : vector<2x256xf32>
    %c0_46 = arith.constant 0 : index
    %c0_47 = arith.constant 0 : index
    %84 = vector.load %arg7[%c0_46, %c0_47] : memref<2x256xf32, #tpu.memory_space<vmem>>, vector<2x256xf32>
    tpu.vector_store %arg7[%c0_46, %c0_47], %83 {strides = array<i32>} : memref<2x256xf32, #tpu.memory_space<vmem>>, vector<2x256xf32>,
    return
  }
  func.func @transform_0(%arg0: i32) -> (i32, i32) {
    %c0_i32 = arith.constant 0 : i32
    %c0_i32_0 = arith.constant 0 : i32
    %c0_i32_1 = arith.constant 0 : i32
    return %c0_i32, %c0_i32_0 : i32, i32
  }
  func.func @transform_1(%arg0: i32) -> (i32, i32) {
    %c0_i32 = arith.constant 0 : i32
    %c0_i32_0 = arith.constant 0 : i32
    %c0_i32_1 = arith.constant 0 : i32
    return %c0_i32, %c0_i32_0 : i32, i32
  }
  func.func @transform_2(%arg0: i32) -> (i32, i32) {
    %c0_i32 = arith.constant 0 : i32
    %c0_i32_0 = arith.constant 0 : i32
    %c0_i32_1 = arith.constant 0 : i32
    return %c0_i32, %c0_i32_0 : i32, i32
  }
  func.func @transform_3(%arg0: i32) -> (i32, i32) {
    %c0_i32 = arith.constant 0 : i32
    %c0_i32_0 = arith.constant 0 : i32
    %c0_i32_1 = arith.constant 0 : i32
    return %c0_i32, %c0_i32_0 : i32, i32
  }
  func.func @transform_4(%arg0: i32) -> (i32, i32) {
    %c0_i32 = arith.constant 0 : i32
    %c0_i32_0 = arith.constant 0 : i32
    %c0_i32_1 = arith.constant 0 : i32
    return %c0_i32, %c0_i32_0 : i32, i32
  }
  func.func @transform_5(%arg0: i32) -> (i32, i32) {
    %c0_i32 = arith.constant 0 : i32
    %c0_i32_0 = arith.constant 0 : i32
    %c0_i32_1 = arith.constant 0 : i32
    return %c0_i32, %c0_i32_0 : i32, i32
  }
  func.func @transform_6(%arg0: i32) -> (i32, i32) {
    %c0_i32 = arith.constant 0 : i32
    %c0_i32_0 = arith.constant 0 : i32
    %c0_i32_1 = arith.constant 0 : i32
    return %c0_i32, %c0_i32_0 : i32, i32
  }
}

</mosaic_0001>

<bundles_post_ra>
// kernel: convae_forward.1
= control target key start
LH: loop header
LB: loop body
LE: loop exit
PB: predicated region body
PF: predicated region fallthrough
CT: control target
= control target key end

     0   :  { %vm43_vm0 = vcmask 523264   ;;  %v2341_v59 = vmov 0   ;;  %s2890_s1 = inlined_call_operand.vmem [shape: f32[64,64], index: 1, kind: input, shape index: {}]   ;;  %s2891_s0 = inlined_call_operand.vmem [shape: f32[32,64], index: 0, kind: input, shape index: {}]   ;;  %s2892_s3 = inlined_call_operand.vmem [shape: f32[64,64], index: 3, kind: input, shape index: {}]   ;;  %s2893_s2 = inlined_call_operand.vmem [shape: f32[1,64], index: 2, kind: input, shape index: {}]   ;;  %s2894_s5 = inlined_call_operand.vmem [shape: bf16[1024,256], index: 5, kind: input, shape index: {}]   ;;  %s2895_s4 = inlined_call_operand.vmem [shape: f32[1,64], index: 4, kind: input, shape index: {}]   ;;  %s2896_s6 = inlined_call_operand.vmem [shape: f32[2,256], index: 6, kind: output, shape index: {}]  }
   0x1   :  { %v28_v0 = vld [vmem:[%s2890_s1] sm:$0xff]  ;;  %v29_v1 = vld [vmem:[%s2890_s1 + $0x8] sm:$0xff]  ;;  %v30_v2 = vld [vmem:[%s2890_s1 + $0x10] sm:$0xff]  ;;  %1028 = vmatprep.mubr.bf16.mxu0 %v2341_v59 }
   0x2   :  { %v2042_v3 = vpack.c.bf16 %v29_v1, %v28_v0  ;;  %v31_v4 = vld [vmem:[%s2890_s1 + $0x18] sm:$0xff]  ;;  %v32_v6 = vld [vmem:[%s2890_s1 + $0x20] sm:$0xff]  ;;  %v33_v7 = vld [vmem:[%s2890_s1 + $0x28] sm:$0xff] }
   0x3   :  { %v2046_v5 = vpack.c.bf16 %v31_v4, %v30_v2  ;;  %v24_v8 = vld [vmem:[%s2891_s0] sm:$0xff]  ;;  %v2050_v9 = vpack.c.bf16 %v33_v7, %v32_v6  ;;  %v34_v10 = vld [vmem:[%s2890_s1 + $0x30] sm:$0xff]  ;;  %v35_v11 = vld [vmem:[%s2890_s1 + $0x38] sm:$0xff] }
   0x4   :  { %2043 = vmatprep.subr.bf16.mxu1 %v2042_v3  ;;  %2014 = vmatprep.mubr.msk.f32.mxu1 %vm43_vm0, %v24_v8  ;;  %v2054_v12 = vpack.c.bf16 %v35_v11, %v34_v10  ;;  %v145_v13 = vld [vmem:[%s2892_s3] sm:$0xff]  ;;  %v146_v14 = vld [vmem:[%s2892_s3 + $0x8] sm:$0xff]  ;;  %v147_v16 = vld [vmem:[%s2892_s3 + $0x10] sm:$0xff] }
   0x5   :  { %2045 = vmatpush3.bf16.msra.mxu1 %v2042_v3  ;;  %v2058_v15 = vpack.c.bf16 %v146_v14, %v145_v13  ;;  %v148_v17 = vld [vmem:[%s2892_s3 + $0x18] sm:$0xff]  ;;  %v25_v18 = vld [vmem:[%s2891_s0 + $0x8] sm:$0xff]  ;;  %v26_v19 = vld [vmem:[%s2891_s0 + $0x10] sm:$0xff] }
   0x6   :  { %2047 = vmatprep.subr.bf16.mxu1 %v2046_v5  ;;  %v2062_v20 = vpack.c.bf16 %v148_v17, %v147_v16  ;;  %v149_v21 = vld [vmem:[%s2892_s3 + $0x20] sm:$0xff]  ;;  %v150_v22 = vld [vmem:[%s2892_s3 + $0x28] sm:$0xff]  ;;  %v27_v23 = vld [vmem:[%s2891_s0 + $0x18] sm:$0xff] }
   0x7   :  { %v2066_v24 = vpack.c.bf16 %v150_v22, %v149_v21  ;;  %v151_v25 = vld [vmem:[%s2892_s3 + $0x30] sm:$0xff]  ;;  %v152_v26 = vld [vmem:[%s2892_s3 + $0x38] sm:$0xff]  ;;  %v1815_v28 = vld [vmem:[%s2893_s2] ss:$0 sm:$0xff] }
   0x8   :  { %v2070_v27 = vpack.c.bf16 %v152_v26, %v151_v25  ;;  %v2135_v41 = vld [vmem:[%s2894_s5 + $0x44] ss:$8 sps:$4 sm:$0xff]   ;;  %v2133_v42 = vld [vmem:[%s2894_s5 + $0x40] ss:$8 sps:$4 sm:$0xff]   ;;  %v2141_v45 = vld [vmem:[%s2894_s5 + $0x54] ss:$8 sps:$4 sm:$0xff]  }
   0x9   :  { %2049 = vmatpush3.bf16.msra.mxu1 %v2046_v5  ;;  %v2136_v43 = vld [vmem:[%s2894_s5 + $0x1c4] ss:$8 sps:$4 sm:$0xff]   ;;  %v2138_v44 = vld [vmem:[%s2894_s5 + $0x1c0] ss:$8 sps:$4 sm:$0xff]   ;;  %v2142_v46 = vld [vmem:[%s2894_s5 + $0x1d4] ss:$8 sps:$4 sm:$0xff]  }
   0xa   :  { %2051 = vmatprep.subr.bf16.mxu1 %v2050_v9  ;;  %996 = vmatprep.subr.bf16.mxu0 %v2136_v43  ;;  %v2139_v47 = vld [vmem:[%s2894_s5 + $0x50] ss:$8 sps:$4 sm:$0xff]   ;;  %v2147_v49 = vld [vmem:[%s2894_s5 + $0x64] ss:$8 sps:$4 sm:$0xff]   ;;  %v2145_v51 = vld [vmem:[%s2894_s5 + $0x60] ss:$8 sps:$4 sm:$0xff]  }
   0xb   :  { %997 = vmatpush1.bf16.msra.mxu0 %v2138_v44  ;;  %v2144_v48 = vld [vmem:[%s2894_s5 + $0x1d0] ss:$8 sps:$4 sm:$0xff]   ;;  %v2148_v50 = vld [vmem:[%s2894_s5 + $0x1e4] ss:$8 sps:$4 sm:$0xff]   ;;  %v2150_v52 = vld [vmem:[%s2894_s5 + $0x1e0] ss:$8 sps:$4 sm:$0xff]  }
   0xc   :  { %998 = vmatprep.subr.bf16.mxu0 %v2142_v46  ;;  %v2153_v53 = vld [vmem:[%s2894_s5 + $0x74] ss:$8 sps:$4 sm:$0xff]   ;;  %v2151_v55 = vld [vmem:[%s2894_s5 + $0x70] ss:$8 sps:$4 sm:$0xff]   ;;  %v2159_v57 = vld [vmem:[%s2894_s5 + $0x4] ss:$8 sps:$4 sm:$0xff]  }
   0xd   :  { %2053 = vmatpush3.bf16.msra.mxu1 %v2050_v9  ;;  %v2154_v54 = vld [vmem:[%s2894_s5 + $0x1f4] ss:$8 sps:$4 sm:$0xff]   ;;  %v2156_v56 = vld [vmem:[%s2894_s5 + $0x1f0] ss:$8 sps:$4 sm:$0xff]   ;;  %v2162_v58 = vld [vmem:[%s2894_s5 + $0x204] ss:$8 sps:$4 sm:$0xff]  }
   0xe   :  { %2055 = vmatprep.subr.bf16.mxu1 %v2054_v12  ;;  %v1820_v60 = vld [vmem:[%s2895_s4] ss:$0 sm:$0xff]  ;;  %v2165_v25 = vld [vmem:[%s2894_s5 + $0x14] ss:$8 sps:$4 sm:$0xff]   ;;  %v2190_v46 = vld [vmem:[%s2894_s5 + $0x250] ss:$8 sps:$4 sm:$0xff]  }
   0xf   :  { %999 = vmatpush1.bf16.msra.mxu0 %v2144_v48  ;;  %v2160_v21 = vld [vmem:[%s2894_s5 + $0x200] ss:$8 sps:$4 sm:$0xff]   ;;  %v2168_v26 = vld [vmem:[%s2894_s5 + $0x214] ss:$8 sps:$4 sm:$0xff]   ;;  %v2198_v48 = vld [vmem:[%s2894_s5 + $0x264] ss:$8 sps:$4 sm:$0xff]  }
  0x10   :  { %1000 = vmatprep.subr.bf16.mxu0 %v2148_v50  ;;  %v2189_v43 = vld [vmem:[%s2894_s5 + $0x94] ss:$8 sps:$4 sm:$0xff]   ;;  %v2196_v50 = vld [vmem:[%s2894_s5 + $0x260] ss:$8 sps:$4 sm:$0xff]  }
  0x11   :  { %2057 = vmatpush3.bf16.msra.mxu1 %v2054_v12  ;;  %v2192_v44 = vld [vmem:[%s2894_s5 + $0x254] ss:$8 sps:$4 sm:$0xff]  }
  0x12   :  { %2059 = vmatprep.subr.bf16.mxu1 %v2058_v15 }
  0x13   :  { %1001 = vmatpush1.bf16.msra.mxu0 %v2150_v52  ;;  %v2204_v52 = vld [vmem:[%s2894_s5 + $0x274] ss:$8 sps:$4 sm:$0xff]  }
  0x14   :  { %2015 = vmatmul.mubr.msk.f32.vlgmr.msra.gmra.mrb[0].mxu1 %vm43_vm0, %v25_v18  ;;  %1002 = vmatprep.subr.bf16.mxu0 %v2154_v54  ;;  %v2202_v54 = vld [vmem:[%s2894_s5 + $0x270] ss:$8 sps:$4 sm:$0xff]  }
  0x15   :  { %2017 = vmatprep.mubr.msk.f32.mxu1 %vm43_vm0, %v26_v19  ;;  %2061 = vmatpush3.bf16.msra.mxu1 %v2058_v15 }
  0x16   :  { %2063 = vmatprep.subr.bf16.mxu1 %v2062_v20 }
  0x17   :  { %1003 = vmatpush1.bf16.msra.mxu0 %v2156_v56  ;;  %v2210_v56 = vld [vmem:[%s2894_s5 + $0x284] ss:$8 sps:$4 sm:$0xff]  }
  0x18   :  { %2018 = vmatmul.mubr.msk.f32.gmra.mrb[2].mxu1 %vm43_vm0, %v27_v23  ;;  %1090 = vmatprep.subr.bf16.mxu0 %v2162_v58  ;;  %v2208_v58 = vld [vmem:[%s2894_s5 + $0x280] ss:$8 sps:$4 sm:$0xff]  }
  0x19   :  { %2065 = vmatpush3.bf16.msra.mxu1 %v2062_v20  ;;  %v2157_v20 = vld [vmem:[%s2894_s5] ss:$8 sps:$4 sm:$0xff]  }
  0x1a   :  { %2067 = vmatprep.subr.bf16.mxu1 %v2066_v24 }
  0x1d   :  { %2069 = vmatpush3.bf16.msra.mxu1 %v2066_v24 }
  0x1e   :  { %2071 = vmatprep.subr.bf16.mxu1 %v2070_v27 }
  0x21   :  { %2073 = vmatpush3.bf16.msra.mxu1 %v2070_v27 }
  0x22   :  { %344 = vmatprep.subr.bf16.mxu1 %v2135_v41  ;;  %v2181_v41 = vld [vmem:[%s2894_s5 + $0x80] ss:$8 sps:$4 sm:$0xff]  }
  0xe7   :  { %v2016_v29 = vpop.f32.mrb[0].mxu1 }
  0xe8   :  { %v128_v30 = vadd.f32 %v2016_v29, %v1815_v28  ;;  %v122_v31 = vpop.f32.mrb[1].mxu1  ;;  %v2163_v29 = vld [vmem:[%s2894_s5 + $0x10] ss:$8 sps:$4 sm:$0xff]  }
  0xe9   :  { %v123_v32 = vadd.f32 %v1815_v28, %v122_v31  ;;  %v2171_v31 = vld [vmem:[%s2894_s5 + $0x24] ss:$8 sps:$4 sm:$0xff]  }
  0xea   :  { %v142_v35 = vmax.f32 %v128_v30, 0.0  ;;  %v2166_v30 = vld [vmem:[%s2894_s5 + $0x210] ss:$8 sps:$4 sm:$0xff]  }
  0xeb   :  { %v141_v33 = vmax.f32 %v123_v32, 0.0  ;;  %v2019_v34 = vpop.f32.mrb[2].mxu1  ;;  %v2174_v32 = vld [vmem:[%s2894_s5 + $0x224] ss:$8 sps:$4 sm:$0xff]  }
  0xec   :  { %v138_v36 = vadd.f32 %v2019_v34, %v1815_v28  ;;  %v132_v37 = vpop.f32.mrb[3].mxu1  ;;  %v2172_v34 = vld [vmem:[%s2894_s5 + $0x220] ss:$8 sps:$4 sm:$0xff]  }
  0xed   :  { %2036 = vmatprep.mubr.msk.f32.mxu1 %vm43_vm0, %v141_v33  ;;  %v133_v38 = vadd.f32 %v1815_v28, %v132_v37  ;;  %v2169_v33 = vld [vmem:[%s2894_s5 + $0x20] ss:$8 sps:$4 sm:$0xff]   ;;  %v2175_v37 = vld [vmem:[%s2894_s5 + $0x30] ss:$8 sps:$4 sm:$0xff]  }
  0xee   :  { %2037 = vmatmul.mubr.msk.f32.vlgmr.msra.gmra.mrb[4].mxu1 %vm43_vm0, %v142_v35  ;;  %v144_v39 = vmax.f32 %v138_v36, 0.0  ;;  %v2177_v35 = vld [vmem:[%s2894_s5 + $0x34] ss:$8 sps:$4 sm:$0xff]  }
  0xef   :  { %v143_v40 = vmax.f32 %v133_v38, 0.0  ;;  %345 = vmatpush1.bf16.msra.mxu1 %v2133_v42  ;;  %v2180_v36 = vld [vmem:[%s2894_s5 + $0x234] ss:$8 sps:$4 sm:$0xff]   ;;  %v2178_v38 = vld [vmem:[%s2894_s5 + $0x230] ss:$8 sps:$4 sm:$0xff]  }
  0xf0   :  { %346 = vmatprep.subr.bf16.mxu1 %v2141_v45  ;;  %v2184_v42 = vld [vmem:[%s2894_s5 + $0x240] ss:$8 sps:$4 sm:$0xff]   ;;  %v2187_v45 = vld [vmem:[%s2894_s5 + $0x90] ss:$8 sps:$4 sm:$0xff]  }
  0xf1   :  { %2039 = vmatprep.mubr.msk.f32.mxu1 %vm43_vm0, %v143_v40  ;;  %v2186_v40 = vld [vmem:[%s2894_s5 + $0x244] ss:$8 sps:$4 sm:$0xff]  }
  0xf2   :  { %2040 = vmatmul.mubr.msk.f32.gmra.mrb[6].mxu1 %vm43_vm0, %v144_v39  ;;  %v2183_v39 = vld [vmem:[%s2894_s5 + $0x84] ss:$8 sps:$4 sm:$0xff]  }
  0xf3   :  { %347 = vmatpush1.bf16.msra.mxu1 %v2139_v47  ;;  %376 = vmatprep.mubr.bf16.mxu1 %v2341_v59  ;;  %v2195_v47 = vld [vmem:[%s2894_s5 + $0xa4] ss:$8 sps:$4 sm:$0xff]  }
  0xf4   :  { %348 = vmatprep.subr.bf16.mxu1 %v2147_v49  ;;  %v2193_v49 = vld [vmem:[%s2894_s5 + $0xa0] ss:$8 sps:$4 sm:$0xff]  }
  0xf7   :  { %349 = vmatpush1.bf16.msra.mxu1 %v2145_v51  ;;  %v2201_v51 = vld [vmem:[%s2894_s5 + $0xb4] ss:$8 sps:$4 sm:$0xff]  }
  0xf8   :  { %350 = vmatprep.subr.bf16.mxu1 %v2153_v53  ;;  %v2199_v53 = vld [vmem:[%s2894_s5 + $0xb0] ss:$8 sps:$4 sm:$0xff]  }
  0xfb   :  { %351 = vmatpush1.bf16.msra.mxu1 %v2151_v55  ;;  %v2207_v55 = vld [vmem:[%s2894_s5 + $0xc4] ss:$8 sps:$4 sm:$0xff]  }
  0xfc   :  { %428 = vmatprep.subr.bf16.mxu1 %v2159_v57  ;;  %v2205_v57 = vld [vmem:[%s2894_s5 + $0xc0] ss:$8 sps:$4 sm:$0xff]  }
 0x1c1   :  { %v2038_v61 = vpop.f32.mrb[4].mxu1 }
 0x1c2   :  { %v244_v62 = vadd.f32 %v2038_v61, %v1820_v60  ;;  %v238_v63 = vpop.f32.mrb[5].mxu1 }
 0x1c3   :  { %v239_v0 = vadd.f32 %v1820_v60, %v238_v63  ;;  %v2216_v63 = vld [vmem:[%s2894_s5 + $0x294] ss:$8 sps:$4 sm:$0xff]  }
 0x1c4   :  { %v1826_v1 = vmul.f32 -1.442695, %v244_v62  ;;  %v2213_v62 = vld [vmem:[%s2894_s5 + $0xd4] ss:$8 sps:$4 sm:$0xff]  }
 0x1c5   :  { %v1825_v2 = vmul.f32 -1.442695, %v239_v0  ;;  %v2041_v3 = vpop.f32.mrb[6].mxu1  ;;  %v2211_v0 = vld [vmem:[%s2894_s5 + $0xd0] ss:$8 sps:$4 sm:$0xff]  }
 0x1c6   :  { %2325 = vpow2.f32 %v1826_v1  ;;  %v254_v4 = vadd.f32 %v2041_v3, %v1820_v60  ;;  %v248_v5 = vpop.f32.mrb[7].mxu1  ;;  %v2214_v1 = vld [vmem:[%s2894_s5 + $0x290] ss:$8 sps:$4 sm:$0xff]   ;;  %v2222_v3 = vld [vmem:[%s2894_s5 + $0x2a4] ss:$8 sps:$4 sm:$0xff]  }
 0x1c7   :  { %2327 = vpow2.f32 %v1825_v2  ;;  %v249_v6 = vadd.f32 %v1820_v60, %v248_v5  ;;  %v2219_v2 = vld [vmem:[%s2894_s5 + $0xe4] ss:$8 sps:$4 sm:$0xff]   ;;  %v2220_v5 = vld [vmem:[%s2894_s5 + $0x2a0] ss:$8 sps:$4 sm:$0xff]  }
 0x1c8   :  { %v1828_v7 = vmul.f32 -1.442695, %v254_v4  ;;  %v2217_v4 = vld [vmem:[%s2894_s5 + $0xe0] ss:$8 sps:$4 sm:$0xff]  }
 0x1c9   :  { %v1827_v8 = vmul.f32 -1.442695, %v249_v6  ;;  %v2225_v6 = vld [vmem:[%s2894_s5 + $0xf4] ss:$8 sps:$4 sm:$0xff]  }
 0x1ca   :  { %2329 = vpow2.f32 %v1828_v7  ;;  %v2228_v7 = vld [vmem:[%s2894_s5 + $0x2b4] ss:$8 sps:$4 sm:$0xff]  }
 0x1cb   :  { %2331 = vpow2.f32 %v1827_v8  ;;  %v2223_v8 = vld [vmem:[%s2894_s5 + $0xf0] ss:$8 sps:$4 sm:$0xff]  }
 0x1d0   :  { %v2326_v9 = vpop.eup %2325 }
 0x1d1   :  { %v2328_v10 = vpop.eup %2327  ;;  %v270_v11 = vadd.f32 1.0, %v2326_v9  ;;  %v2226_v9 = vld [vmem:[%s2894_s5 + $0x2b0] ss:$8 sps:$4 sm:$0xff]  }
 0x1d2   :  { %v269_v12 = vadd.f32 1.0, %v2328_v10  ;;  %v2231_v10 = vld [vmem:[%s2894_s5 + $0x104] ss:$8 sps:$4 sm:$0xff]  }
 0x1d3   :  { %2333 = vrcp.f32 %v270_v11  ;;  %v2234_v11 = vld [vmem:[%s2894_s5 + $0x2c4] ss:$8 sps:$4 sm:$0xff]  }
 0x1d4   :  { %v2330_v13 = vpop.eup %2329  ;;  %2335 = vrcp.f32 %v269_v12  ;;  %v2229_v12 = vld [vmem:[%s2894_s5 + $0x100] ss:$8 sps:$4 sm:$0xff]  }
 0x1d5   :  { %v2332_v14 = vpop.eup %2331  ;;  %v272_v15 = vadd.f32 1.0, %v2330_v13  ;;  %v2232_v13 = vld [vmem:[%s2894_s5 + $0x2c0] ss:$8 sps:$4 sm:$0xff]  }
 0x1d6   :  { %v271_v16 = vadd.f32 1.0, %v2332_v14 }
 0x1d7   :  { %2337 = vrcp.f32 %v272_v15 }
 0x1d8   :  { %2339 = vrcp.f32 %v271_v16  ;;  %v2237_v16 = vld [vmem:[%s2894_s5 + $0x114] ss:$8 sps:$4 sm:$0xff]  }
 0x1dd   :  { %v2334_v17 = vpop.eup %2333 }
 0x1de   :  { %v2336_v18 = vpop.eup %2335 }
 0x1df   :  { %v2507_v19 = vpack.c.bf16 %v2334_v17, %v2336_v18  ;;  %v2240_v17 = vld [vmem:[%s2894_s5 + $0x2d4] ss:$8 sps:$4 sm:$0xff]   ;;  %v2235_v18 = vld [vmem:[%s2894_s5 + $0x110] ss:$8 sps:$4 sm:$0xff]  }
 0x1e1   :  { %v2338_v22 = vpop.eup %2337  ;;  %v300_v23 = vrot.slane %v2507_v19, 1  ;;  %v952_v24 = vrot.slane %v2507_v19, 7  ;;  %v477_v60 = vrot.slane %v2507_v19, 2  ;;  %v572_v14 = vrot.slane %v2507_v19, 3 }
 0x1e2   :  { %v2340_v27 = vpop.eup %2339 }
 0x1e3   :  { %v2523_v28 = vpack.c.bf16 %v2338_v22, %v2340_v27  ;;  %1837 = vmatmul.mubr.msk.bf16.vlgmr.msra.gmra.mrb[8].mxu1 %vm43_vm0, %v300_v23  ;;  %1900 = vmatmul.mubr.msk.bf16.vlgmr.msra.gmra.mrb[0].mxu0 %vm43_vm0, %v952_v24  ;;  %v2246_v22 = vld [vmem:[%s2894_s5 + $0x2e4] ss:$8 sps:$4 sm:$0xff]   ;;  %v2241_v23 = vld [vmem:[%s2894_s5 + $0x120] ss:$8 sps:$4 sm:$0xff]   ;;  %v2247_v27 = vld [vmem:[%s2894_s5 + $0x130] ss:$8 sps:$4 sm:$0xff]  }
 0x1e4   :  { %429 = vmatpush1.bf16.msra.mxu1 %v2157_v20  ;;  %1091 = vmatpush1.bf16.msra.mxu0 %v2160_v21  ;;  %v2238_v20 = vld [vmem:[%s2894_s5 + $0x2d0] ss:$8 sps:$4 sm:$0xff]   ;;  %v2243_v21 = vld [vmem:[%s2894_s5 + $0x124] ss:$8 sps:$4 sm:$0xff]   ;;  %v2244_v24 = vld [vmem:[%s2894_s5 + $0x2e0] ss:$8 sps:$4 sm:$0xff]  }
 0x1e5   :  { %430 = vmatprep.subr.bf16.mxu1 %v2165_v25  ;;  %1092 = vmatprep.subr.bf16.mxu0 %v2168_v26  ;;  %v1142_v61 = vrot.slane %v2523_v28, 1  ;;  %v1237_v15 = vrot.slane %v2523_v28, 2  ;;  %v2249_v25 = vld [vmem:[%s2894_s5 + $0x134] ss:$8 sps:$4 sm:$0xff]  }
 0x1e6   :  { %460 = vmatprep.mubr.bf16.mxu1 %v2341_v59  ;;  %1122 = vmatprep.mubr.bf16.mxu0 %v2341_v59  ;;  %v2252_v26 = vld [vmem:[%s2894_s5 + $0x2f4] ss:$8 sps:$4 sm:$0xff]  }
 0x1e8   :  { %431 = vmatpush1.bf16.msra.mxu1 %v2163_v29  ;;  %1093 = vmatpush1.bf16.msra.mxu0 %v2166_v30  ;;  %v2250_v29 = vld [vmem:[%s2894_s5 + $0x2f0] ss:$8 sps:$4 sm:$0xff]   ;;  %v2255_v30 = vld [vmem:[%s2894_s5 + $0x144] ss:$8 sps:$4 sm:$0xff]  }
 0x1e9   :  { %432 = vmatprep.subr.bf16.mxu1 %v2171_v31  ;;  %1094 = vmatprep.subr.bf16.mxu0 %v2174_v32  ;;  %v2258_v31 = vld [vmem:[%s2894_s5 + $0x304] ss:$8 sps:$4 sm:$0xff]   ;;  %v2253_v32 = vld [vmem:[%s2894_s5 + $0x140] ss:$8 sps:$4 sm:$0xff]  }
 0x1ec   :  { %433 = vmatpush1.bf16.msra.mxu1 %v2169_v33  ;;  %1095 = vmatpush1.bf16.msra.mxu0 %v2172_v34  ;;  %v2256_v33 = vld [vmem:[%s2894_s5 + $0x300] ss:$8 sps:$4 sm:$0xff]   ;;  %v667_v34 = vrot.slane %v2507_v19, 4 }
 0x1ed   :  { %434 = vmatprep.subr.bf16.mxu1 %v2177_v35  ;;  %1096 = vmatprep.subr.bf16.mxu0 %v2180_v36  ;;  %v1332_v35 = vrot.slane %v2523_v28, 3  ;;  %v2261_v36 = vld [vmem:[%s2894_s5 + $0x154] ss:$8 sps:$4 sm:$0xff]  }
 0x1f0   :  { %435 = vmatpush1.bf16.msra.mxu1 %v2175_v37  ;;  %1097 = vmatpush1.bf16.msra.mxu0 %v2178_v38  ;;  %v2264_v37 = vld [vmem:[%s2894_s5 + $0x314] ss:$8 sps:$4 sm:$0xff]   ;;  %v2259_v38 = vld [vmem:[%s2894_s5 + $0x150] ss:$8 sps:$4 sm:$0xff]  }
 0x1f1   :  { %521 = vmatprep.subr.bf16.mxu1 %v2183_v39  ;;  %1186 = vmatprep.subr.bf16.mxu0 %v2186_v40  ;;  %v2262_v39 = vld [vmem:[%s2894_s5 + $0x310] ss:$8 sps:$4 sm:$0xff]   ;;  %v2267_v40 = vld [vmem:[%s2894_s5 + $0x164] ss:$8 sps:$4 sm:$0xff]  }
 0x1f3   :  { %1846 = vmatmul.mubr.msk.bf16.vlgmr.msra.gmra.mrb[8].mxu1 %vm43_vm0, %v2507_v19  ;;  %1909 = vmatmul.mubr.msk.bf16.vlgmr.msra.gmra.mrb[0].mxu0 %vm43_vm0, %v2523_v28 }
 0x1f4   :  { %522 = vmatpush1.bf16.msra.mxu1 %v2181_v41  ;;  %1187 = vmatpush1.bf16.msra.mxu0 %v2184_v42  ;;  %v2270_v41 = vld [vmem:[%s2894_s5 + $0x324] ss:$8 sps:$4 sm:$0xff]   ;;  %v2265_v42 = vld [vmem:[%s2894_s5 + $0x160] ss:$8 sps:$4 sm:$0xff]  }
 0x1f5   :  { %523 = vmatprep.subr.bf16.mxu1 %v2189_v43  ;;  %1188 = vmatprep.subr.bf16.mxu0 %v2192_v44  ;;  %v2268_v43 = vld [vmem:[%s2894_s5 + $0x320] ss:$8 sps:$4 sm:$0xff]   ;;  %v2273_v44 = vld [vmem:[%s2894_s5 + $0x174] ss:$8 sps:$4 sm:$0xff]  }
 0x1f6   :  { %553 = vmatprep.mubr.bf16.mxu1 %v2341_v59  ;;  %1218 = vmatprep.mubr.bf16.mxu0 %v2341_v59 }
 0x1f8   :  { %524 = vmatpush1.bf16.msra.mxu1 %v2187_v45  ;;  %1189 = vmatpush1.bf16.msra.mxu0 %v2190_v46  ;;  %v2276_v45 = vld [vmem:[%s2894_s5 + $0x334] ss:$8 sps:$4 sm:$0xff]   ;;  %v2271_v46 = vld [vmem:[%s2894_s5 + $0x170] ss:$8 sps:$4 sm:$0xff]  }
 0x1f9   :  { %525 = vmatprep.subr.bf16.mxu1 %v2195_v47  ;;  %1190 = vmatprep.subr.bf16.mxu0 %v2198_v48  ;;  %v2274_v47 = vld [vmem:[%s2894_s5 + $0x330] ss:$8 sps:$4 sm:$0xff]   ;;  %v2279_v48 = vld [vmem:[%s2894_s5 + $0x184] ss:$8 sps:$4 sm:$0xff]  }
 0x1fc   :  { %526 = vmatpush1.bf16.msra.mxu1 %v2193_v49  ;;  %1191 = vmatpush1.bf16.msra.mxu0 %v2196_v50  ;;  %v2282_v49 = vld [vmem:[%s2894_s5 + $0x344] ss:$8 sps:$4 sm:$0xff]   ;;  %v2277_v50 = vld [vmem:[%s2894_s5 + $0x180] ss:$8 sps:$4 sm:$0xff]  }
 0x1fd   :  { %527 = vmatprep.subr.bf16.mxu1 %v2201_v51  ;;  %1192 = vmatprep.subr.bf16.mxu0 %v2204_v52  ;;  %v2280_v51 = vld [vmem:[%s2894_s5 + $0x340] ss:$8 sps:$4 sm:$0xff]   ;;  %v762_v52 = vrot.slane %v2507_v19, 5 }
 0x200   :  { %528 = vmatpush1.bf16.msra.mxu1 %v2199_v53  ;;  %1193 = vmatpush1.bf16.msra.mxu0 %v2202_v54  ;;  %v1427_v53 = vrot.slane %v2523_v28, 4  ;;  %v2285_v54 = vld [vmem:[%s2894_s5 + $0x194] ss:$8 sps:$4 sm:$0xff]  }
 0x201   :  { %616 = vmatprep.subr.bf16.mxu1 %v2207_v55  ;;  %1281 = vmatprep.subr.bf16.mxu0 %v2210_v56  ;;  %v2288_v55 = vld [vmem:[%s2894_s5 + $0x354] ss:$8 sps:$4 sm:$0xff]   ;;  %v2283_v56 = vld [vmem:[%s2894_s5 + $0x190] ss:$8 sps:$4 sm:$0xff]  }
 0x203   :  { %1855 = vmatmul.mubr.msk.bf16.vlgmr.msra.gmra.mrb[8].mxu1 %vm43_vm0, %v477_v60  ;;  %1918 = vmatmul.mubr.msk.bf16.vlgmr.msra.gmra.mrb[0].mxu0 %vm43_vm0, %v1142_v61  ;;  %v2294_v60 = vld [vmem:[%s2894_s5 + $0x364] ss:$8 sps:$4 sm:$0xff]   ;;  %v2289_v61 = vld [vmem:[%s2894_s5 + $0x1a0] ss:$8 sps:$4 sm:$0xff]  }
 0x204   :  { %617 = vmatpush1.bf16.msra.mxu1 %v2205_v57  ;;  %1282 = vmatpush1.bf16.msra.mxu0 %v2208_v58  ;;  %v2286_v57 = vld [vmem:[%s2894_s5 + $0x350] ss:$8 sps:$4 sm:$0xff]   ;;  %v2291_v58 = vld [vmem:[%s2894_s5 + $0x1a4] ss:$8 sps:$4 sm:$0xff]  }
 0x205   :  { %618 = vmatprep.subr.bf16.mxu1 %v2213_v62  ;;  %1283 = vmatprep.subr.bf16.mxu0 %v2216_v63  ;;  %v2292_v62 = vld [vmem:[%s2894_s5 + $0x360] ss:$8 sps:$4 sm:$0xff]   ;;  %v2297_v63 = vld [vmem:[%s2894_s5 + $0x1b4] ss:$8 sps:$4 sm:$0xff]  }
 0x206   :  { %648 = vmatprep.mubr.bf16.mxu1 %v2341_v59  ;;  %1313 = vmatprep.mubr.bf16.mxu0 %v2341_v59 }
 0x208   :  { %619 = vmatpush1.bf16.msra.mxu1 %v2211_v0  ;;  %1284 = vmatpush1.bf16.msra.mxu0 %v2214_v1  ;;  %v2300_v0 = vld [vmem:[%s2894_s5 + $0x374] ss:$8 sps:$4 sm:$0xff]   ;;  %v2295_v1 = vld [vmem:[%s2894_s5 + $0x1b0] ss:$8 sps:$4 sm:$0xff]  }
 0x209   :  { %620 = vmatprep.subr.bf16.mxu1 %v2219_v2  ;;  %1285 = vmatprep.subr.bf16.mxu0 %v2222_v3  ;;  %v2298_v2 = vld [vmem:[%s2894_s5 + $0x370] ss:$8 sps:$4 sm:$0xff]   ;;  %v2303_v3 = vld [vmem:[%s2894_s5 + $0x384] ss:$8 sps:$4 sm:$0xff]  }
 0x20c   :  { %621 = vmatpush1.bf16.msra.mxu1 %v2217_v4  ;;  %1286 = vmatpush1.bf16.msra.mxu0 %v2220_v5  ;;  %v2301_v4 = vld [vmem:[%s2894_s5 + $0x380] ss:$8 sps:$4 sm:$0xff]   ;;  %v857_v5 = vrot.slane %v2507_v19, 6  ;;  %v2309_v19 = vld [vmem:[%s2894_s5 + $0x3a4] ss:$8 sps:$4 sm:$0xff]  }
 0x20d   :  { %622 = vmatprep.subr.bf16.mxu1 %v2225_v6  ;;  %1287 = vmatprep.subr.bf16.mxu0 %v2228_v7  ;;  %v1522_v6 = vrot.slane %v2523_v28, 5  ;;  %v2306_v7 = vld [vmem:[%s2894_s5 + $0x394] ss:$8 sps:$4 sm:$0xff]  }
 0x210   :  { %623 = vmatpush1.bf16.msra.mxu1 %v2223_v8  ;;  %1288 = vmatpush1.bf16.msra.mxu0 %v2226_v9  ;;  %v2304_v8 = vld [vmem:[%s2894_s5 + $0x390] ss:$8 sps:$4 sm:$0xff]   ;;  %v2307_v9 = vld [vmem:[%s2894_s5 + $0x3a0] ss:$8 sps:$4 sm:$0xff]  }
 0x211   :  { %711 = vmatprep.subr.bf16.mxu1 %v2231_v10  ;;  %1376 = vmatprep.subr.bf16.mxu0 %v2234_v11  ;;  %v2312_v10 = vld [vmem:[%s2894_s5 + $0x3b4] ss:$8 sps:$4 sm:$0xff]   ;;  %v2310_v11 = vld [vmem:[%s2894_s5 + $0x3b0] ss:$8 sps:$4 sm:$0xff]  }
 0x213   :  { %1864 = vmatmul.mubr.msk.bf16.vlgmr.msra.gmra.mrb[8].mxu1 %vm43_vm0, %v572_v14  ;;  %1927 = vmatmul.mubr.msk.bf16.vlgmr.msra.gmra.mrb[0].mxu0 %vm43_vm0, %v1237_v15  ;;  %v1617_v14 = vrot.slane %v2523_v28, 6  ;;  %v2318_v15 = vld [vmem:[%s2894_s5 + $0x3d4] ss:$8 sps:$4 sm:$0xff]  }
 0x214   :  { %712 = vmatpush1.bf16.msra.mxu1 %v2229_v12  ;;  %1377 = vmatpush1.bf16.msra.mxu0 %v2232_v13  ;;  %v2315_v12 = vld [vmem:[%s2894_s5 + $0x3c4] ss:$8 sps:$4 sm:$0xff]   ;;  %v2313_v13 = vld [vmem:[%s2894_s5 + $0x3c0] ss:$8 sps:$4 sm:$0xff]  }
 0x215   :  { %713 = vmatprep.subr.bf16.mxu1 %v2237_v16  ;;  %1378 = vmatprep.subr.bf16.mxu0 %v2240_v17  ;;  %v2316_v16 = vld [vmem:[%s2894_s5 + $0x3d0] ss:$8 sps:$4 sm:$0xff]   ;;  %v2321_v17 = vld [vmem:[%s2894_s5 + $0x3e4] ss:$8 sps:$4 sm:$0xff]  }
 0x216   :  { %743 = vmatprep.mubr.bf16.mxu1 %v2341_v59  ;;  %1408 = vmatprep.mubr.bf16.mxu0 %v2341_v59 }
 0x218   :  { %714 = vmatpush1.bf16.msra.mxu1 %v2235_v18  ;;  %1379 = vmatpush1.bf16.msra.mxu0 %v2238_v20  ;;  %v2319_v18 = vld [vmem:[%s2894_s5 + $0x3e0] ss:$8 sps:$4 sm:$0xff]   ;;  %v2324_v20 = vld [vmem:[%s2894_s5 + $0x3f4] ss:$8 sps:$4 sm:$0xff]  }
 0x219   :  { %715 = vmatprep.subr.bf16.mxu1 %v2243_v21  ;;  %1380 = vmatprep.subr.bf16.mxu0 %v2246_v22  ;;  %v1712_v21 = vrot.slane %v2523_v28, 7 }
 0x21c   :  { %716 = vmatpush1.bf16.msra.mxu1 %v2241_v23  ;;  %1381 = vmatpush1.bf16.msra.mxu0 %v2244_v24 }
 0x21d   :  { %717 = vmatprep.subr.bf16.mxu1 %v2249_v25  ;;  %1382 = vmatprep.subr.bf16.mxu0 %v2252_v26 }
 0x220   :  { %718 = vmatpush1.bf16.msra.mxu1 %v2247_v27  ;;  %1383 = vmatpush1.bf16.msra.mxu0 %v2250_v29 }
 0x221   :  { %806 = vmatprep.subr.bf16.mxu1 %v2255_v30  ;;  %1471 = vmatprep.subr.bf16.mxu0 %v2258_v31 }
 0x223   :  { %1873 = vmatmul.mubr.msk.bf16.vlgmr.msra.gmra.mrb[8].mxu1 %vm43_vm0, %v667_v34  ;;  %1936 = vmatmul.mubr.msk.bf16.vlgmr.msra.gmra.mrb[0].mxu0 %vm43_vm0, %v1332_v35 }
 0x224   :  { %807 = vmatpush1.bf16.msra.mxu1 %v2253_v32  ;;  %1472 = vmatpush1.bf16.msra.mxu0 %v2256_v33 }
 0x225   :  { %808 = vmatprep.subr.bf16.mxu1 %v2261_v36  ;;  %1473 = vmatprep.subr.bf16.mxu0 %v2264_v37 }
 0x226   :  { %838 = vmatprep.mubr.bf16.mxu1 %v2341_v59  ;;  %1503 = vmatprep.mubr.bf16.mxu0 %v2341_v59 }
 0x228   :  { %809 = vmatpush1.bf16.msra.mxu1 %v2259_v38  ;;  %1474 = vmatpush1.bf16.msra.mxu0 %v2262_v39 }
 0x229   :  { %810 = vmatprep.subr.bf16.mxu1 %v2267_v40  ;;  %1475 = vmatprep.subr.bf16.mxu0 %v2270_v41 }
 0x22c   :  { %811 = vmatpush1.bf16.msra.mxu1 %v2265_v42  ;;  %1476 = vmatpush1.bf16.msra.mxu0 %v2268_v43 }
 0x22d   :  { %812 = vmatprep.subr.bf16.mxu1 %v2273_v44  ;;  %1477 = vmatprep.subr.bf16.mxu0 %v2276_v45 }
 0x230   :  { %813 = vmatpush1.bf16.msra.mxu1 %v2271_v46  ;;  %1478 = vmatpush1.bf16.msra.mxu0 %v2274_v47 }
 0x231   :  { %901 = vmatprep.subr.bf16.mxu1 %v2279_v48  ;;  %1566 = vmatprep.subr.bf16.mxu0 %v2282_v49 }
 0x233   :  { %1882 = vmatmul.mubr.msk.bf16.vlgmr.msra.gmra.mrb[8].mxu1 %vm43_vm0, %v762_v52  ;;  %1945 = vmatmul.mubr.msk.bf16.vlgmr.msra.gmra.mrb[0].mxu0 %vm43_vm0, %v1427_v53 }
 0x234   :  { %902 = vmatpush1.bf16.msra.mxu1 %v2277_v50  ;;  %1567 = vmatpush1.bf16.msra.mxu0 %v2280_v51 }
 0x235   :  { %903 = vmatprep.subr.bf16.mxu1 %v2285_v54  ;;  %1568 = vmatprep.subr.bf16.mxu0 %v2288_v55 }
 0x236   :  { %933 = vmatprep.mubr.bf16.mxu1 %v2341_v59  ;;  %1598 = vmatprep.mubr.bf16.mxu0 %v2341_v59 }
 0x238   :  { %904 = vmatpush1.bf16.msra.mxu1 %v2283_v56  ;;  %1569 = vmatpush1.bf16.msra.mxu0 %v2286_v57 }
 0x239   :  { %905 = vmatprep.subr.bf16.mxu1 %v2291_v58  ;;  %1570 = vmatprep.subr.bf16.mxu0 %v2294_v60 }
 0x23c   :  { %906 = vmatpush1.bf16.msra.mxu1 %v2289_v61  ;;  %1571 = vmatpush1.bf16.msra.mxu0 %v2292_v62 }
 0x23d   :  { %907 = vmatprep.subr.bf16.mxu1 %v2297_v63  ;;  %1572 = vmatprep.subr.bf16.mxu0 %v2300_v0 }
 0x240   :  { %908 = vmatpush1.bf16.msra.mxu1 %v2295_v1  ;;  %1573 = vmatpush1.bf16.msra.mxu0 %v2298_v2 }
 0x241   :  { %1661 = vmatprep.subr.bf16.mxu0 %v2303_v3 }
 0x243   :  { %1891 = vmatmul.mubr.msk.bf16.vlgmr.msra.gmra.mrb[8].mxu1 %vm43_vm0, %v857_v5  ;;  %1954 = vmatmul.mubr.msk.bf16.vlgmr.msra.gmra.mrb[0].mxu0 %vm43_vm0, %v1522_v6 }
 0x244   :  { %1662 = vmatpush1.bf16.msra.mxu0 %v2301_v4  ;;  %1693 = vmatprep.mubr.bf16.mxu0 %v2341_v59 }
 0x245   :  { %1663 = vmatprep.subr.bf16.mxu0 %v2306_v7 }
 0x248   :  { %1664 = vmatpush1.bf16.msra.mxu0 %v2304_v8 }
 0x249   :  { %1665 = vmatprep.subr.bf16.mxu0 %v2309_v19 }
 0x24c   :  { %1666 = vmatpush1.bf16.msra.mxu0 %v2307_v9 }
 0x24d   :  { %1667 = vmatprep.subr.bf16.mxu0 %v2312_v10 }
 0x250   :  { %1668 = vmatpush1.bf16.msra.mxu0 %v2310_v11 }
 0x251   :  { %1756 = vmatprep.subr.bf16.mxu0 %v2315_v12 }
 0x253   :  { %1963 = vmatmul.mubr.msk.bf16.vlgmr.msra.gmra.mrb[0].mxu0 %vm43_vm0, %v1617_v14 }
 0x254   :  { %1757 = vmatpush1.bf16.msra.mxu0 %v2313_v13  ;;  %1788 = vmatprep.mubr.bf16.mxu0 %v2341_v59  ;;  %v2322_v59 = vld [vmem:[%s2894_s5 + $0x3f0] ss:$8 sps:$4 sm:$0xff]  }
 0x255   :  { %1758 = vmatprep.subr.bf16.mxu0 %v2318_v15 }
 0x258   :  { %1759 = vmatpush1.bf16.msra.mxu0 %v2316_v16 }
 0x259   :  { %1760 = vmatprep.subr.bf16.mxu0 %v2321_v17 }
 0x25c   :  { %1761 = vmatpush1.bf16.msra.mxu0 %v2319_v18 }
 0x25d   :  { %1762 = vmatprep.subr.bf16.mxu0 %v2324_v20 }
 0x260   :  { %1763 = vmatpush1.bf16.msra.mxu0 %v2322_v59 }
 0x263   :  { %1972 = vmatmul.mubr.msk.bf16.vlgmr.msra.gmra.mrb[0].mxu0 %vm43_vm0, %v1712_v21 }
 0x316   :  { %v935_v22 = vpop.f32.mrb[8].mxu1 }
 0x317   :  { %v937_v23 = vpop.f32.mrb[9].mxu1 }
 0x318   :  { %v939_v24 = vpop.f32.mrb[10].mxu1 }
 0x319   :  { %v940_v25 = vpop.f32.mrb[11].mxu1 }
 0x336   :  { %v1790_v26 = vpop.f32.mrb[0].mxu0 }
 0x337   :  { %v2074_v27 = vadd.f32 %v1790_v26, %v935_v22  ;;  %v1792_v29 = vpop.f32.mrb[1].mxu0 }
 0x338   :  { %v2075_v30 = vadd.f32 %v1792_v29, %v937_v23  ;;  %v1794_v31 = vpop.f32.mrb[2].mxu0 }
 0x339   :  { %v1795_v32 = vpop.f32.mrb[3].mxu0 }
 0x33a   :  { %v1801_v33 = vcombine.low %v2074_v27, %v2075_v30 }
 0x33c   :  { %1973 = vst.sshfl [vmem:[%s2896_s6] sm:$0x33 pattern:$0x76325410] %v1801_v33 }

</bundles_post_ra>
